<compile_context>
chip_gen: v7x
topology: tpu7x:2x2x1
jax: 0.10.0
libtpu: 0.0.40
codegen_flags: <defaults>
</compile_context>

<pallas_src>
import math

import jax
import jax.numpy as jnp
from jax.experimental import pallas as pl
from jax.experimental.pallas import tpu as pltpu


_LANES = 1024  # widest lane-dense slab width


def _make_softplus_kernel(b: float):
    """softplus(x + b) with PyTorch's threshold=20 stable formulation.

    b is a trace-time Python-float constant (fixed at module __init__), so there
    is no per-step SMEM load / scalar broadcast.
    """

    def kernel(x_ref, o_ref):
        # Math in f32 for accuracy; I/O stays in the input dtype (halves HBM traffic for bf16).
        # TODO(synk): on v6e/v7x with bf16 I/O the exp/log1p could run in bf16 (bf16 EUP)
        # to halve transcendental pushes once HBM stops being the limiter; kept f32 for v5e.
        x = x_ref[...].astype(jnp.float32) + b
        safe_x = jnp.minimum(x, 20.0)
        o_ref[...] = jnp.where(x > 20.0, x, jnp.log1p(jnp.exp(safe_x))).astype(o_ref.dtype)

    return kernel


def _vmem_plan():
    """Return (per-buffer target bytes, explicit vmem limit) tuned per TPU generation."""
    cap = None
    try:
        cap = int(pltpu.get_tpu_info().vmem_capacity_bytes)
    except Exception:
        cap = None
    if cap is not None and cap >= (128 << 20):
        # v5e / v6e: 128 MiB physical VMEM -> 6 MiB tiles; raise the scoped limit explicitly.
        return 6 << 20, 64 << 20
    # v7x (64 MiB per TensorCore) or unknown: stay within the 32 MiB scoped default.
    return 4 << 20, 32 << 20


def softplus_pallas(x_2d: jax.Array, b: float) -> jax.Array:
    """x_2d: (rows, _LANES) slab; b: Python float scalar."""
    rows, lanes = x_2d.shape
    assert lanes % 128 == 0, "slab lane dim must be a multiple of 128"
    itemsize = jnp.dtype(x_2d.dtype).itemsize

    # Packed-sublane row multiple: 8 for f32, 16 for bf16, 32 for int8/fp8.
    sublane = max(8, 32 // itemsize)

    target_bytes, vmem_limit = _vmem_plan()
    block_rows = max(sublane, (target_bytes // (lanes * itemsize)) // sublane * sublane)
    if rows <= block_rows:
        # Full-extent block: allowed for any row count.
        block_rows = rows

    n_elems = rows * lanes
    cost = pl.CostEstimate(
        flops=5 * n_elems,            # add, min, cmp, select, log1p-add
        transcendentals=2 * n_elems,  # exp + log
        bytes_accessed=2 * n_elems * itemsize,
    )

    return pl.pallas_call(
        _make_softplus_kernel(b),
        out_shape=jax.ShapeDtypeStruct((rows, lanes), x_2d.dtype),
        grid=(pl.cdiv(rows, block_rows),),
        in_specs=[pl.BlockSpec((block_rows, lanes), lambda i: (i, 0))],
        out_specs=pl.BlockSpec((block_rows, lanes), lambda i: (i, 0)),
        compiler_params=pltpu.CompilerParams(
            dimension_semantics=("parallel",),
            vmem_limit_bytes=vmem_limit,
        ),
        cost_estimate=cost,
    )(x_2d)


class SoftPlusPallas:
    """Mirror of the PyTorch SoftPlus module."""

    def __init__(self, voxel_size: float, alpha_init: float = 1e-06):
        self.alpha_init = float(alpha_init)
        self.voxel_size = float(voxel_size)
        _power = -(1.0 / self.voxel_size)  # computed but unused in the reference module
        self.b = math.log(1.0 / (1.0 - self.alpha_init) - 1.0)
        print("b:", self.b)

    def __call__(self, pre_density: jax.Array) -> jax.Array:
        orig_shape = pre_density.shape
        orig_dtype = pre_density.dtype
        flat = pre_density.reshape(-1)
        n = flat.shape[0]

        n_main = (n // _LANES) * _LANES
        if n_main == 0:
            # Tiny input: not worth a kernel launch.
            return jax.nn.softplus(
                pre_density.astype(jnp.float32) + self.b
            ).astype(orig_dtype)

        main = flat if n_main == n else flat[:n_main]
        out_main = softplus_pallas(main.reshape(-1, _LANES), self.b).reshape(-1)

        if n_main == n:
            out = out_main
        else:
            # Ragged tail (< _LANES elements) handled with plain JAX — avoids the
            # pad-concatenate + output-slice extra HBM passes of the old path.
            tail = flat[n_main:]
            out_tail = jax.nn.softplus(
                tail.astype(jnp.float32) + self.b
            ).astype(orig_dtype)
            out = jnp.concatenate([out_main, out_tail])
        return out.reshape(orig_shape)


if __name__ == "__main__":
    key = jax.random.PRNGKey(0)
    mod = SoftPlusPallas(voxel_size=0.01, alpha_init=1e-06)
    b = mod.b

    # small NCHW input: batch=2, channels=4, spatial=16x16 (2048 elems, lane-aligned path)
    x = jax.random.normal(key, (2, 4, 16, 16), dtype=jnp.float32) * 5.0
    y = jax.block_until_ready(mod(x))
    ref = jax.nn.softplus(x + b)
    assert y.shape == x.shape and y.dtype == x.dtype
    assert jnp.max(jnp.abs(y - ref)) < 1e-5, "mismatch vs reference (aligned)"

    # ragged size: exercises prefix-kernel + tiny plain-JAX tail path
    x2 = jax.random.normal(jax.random.PRNGKey(1), (3, 5, 7, 11), dtype=jnp.float32) * 5.0
    y2 = jax.block_until_ready(mod(x2))
    ref2 = jax.nn.softplus(x2 + b)
    assert y2.shape == x2.shape and y2.dtype == x2.dtype
    assert jnp.max(jnp.abs(y2 - ref2)) < 1e-5, "mismatch vs reference (ragged)"

    # bf16 I/O path (block_rows rounded to the 16-row packed-sublane multiple)
    x3 = (jax.random.normal(jax.random.PRNGKey(2), (2, 8, 16, 16)) * 5.0).astype(jnp.bfloat16)
    y3 = jax.block_until_ready(mod(x3))
    assert y3.shape == x3.shape and y3.dtype == x3.dtype
    assert bool(jnp.all(jnp.isfinite(y3.astype(jnp.float32)))), "non-finite bf16 output"

    print("KERNEL_OK")
</pallas_src>

<mosaic_0001>
module attributes {stable_mosaic.version = 11 : i64} {
  func.func @kernel(%arg0: i32, %arg1: memref<2x1024xf32, #tpu.memory_space<vmem>>, %arg2: memref<2x1024xf32, #tpu.memory_space<vmem>>) attributes {dimension_semantics = [#tpu.dimension_semantics<parallel>], iteration_bounds = array<i64: 1>, scalar_prefetch = 0 : i64, scratch_operands = 0 : i64, tpu.core_type = #tpu.core_type<tc>, window_params = [{transform_indices = @transform_0, window_bounds = array<i64: 2, 1024>}, {transform_indices = @transform_1, window_bounds = array<i64: 2, 1024>}]} {
    %c0 = arith.constant 0 : index
    %c0_0 = arith.constant 0 : index
    %0 = vector.load %arg1[%c0, %c0_0] : memref<2x1024xf32, #tpu.memory_space<vmem>>, vector<2x1024xf32>
    %cst = arith.constant -13.8155098 : f32
    %1 = vector.broadcast %cst : f32 to vector<2x1024xf32>
    %2 = arith.addf %0, %1 : vector<2x1024xf32>
    %cst_1 = arith.constant 2.000000e+01 : f32
    %3 = vector.broadcast %cst_1 : f32 to vector<2x1024xf32>
    %4 = arith.minimumf %2, %3 : vector<2x1024xf32>
    %cst_2 = arith.constant 2.000000e+01 : f32
    %5 = vector.broadcast %cst_2 : f32 to vector<2x1024xf32>
    %6 = arith.cmpf ogt, %2, %5 : vector<2x1024xf32>
    %7 = math.exp %4 : vector<2x1024xf32>
    %8 = math.log1p %7 : vector<2x1024xf32>
    %9 = arith.select %6, %2, %8 : vector<2x1024xi1>, vector<2x1024xf32>
    %c0_3 = arith.constant 0 : index
    %c0_4 = arith.constant 0 : index
    %10 = vector.load %arg2[%c0_3, %c0_4] : memref<2x1024xf32, #tpu.memory_space<vmem>>, vector<2x1024xf32>
    tpu.vector_store %arg2[%c0_3, %c0_4], %9 {strides = array<i32>} : memref<2x1024xf32, #tpu.memory_space<vmem>>, vector<2x1024xf32>,
    return
  }
  func.func @transform_0(%arg0: i32) -> (i32, i32) {
    %c0_i32 = arith.constant 0 : i32
    %c0_i32_0 = arith.constant 0 : i32
    return %arg0, %c0_i32 : i32, i32
  }
  func.func @transform_1(%arg0: i32) -> (i32, i32) {
    %c0_i32 = arith.constant 0 : i32
    %c0_i32_0 = arith.constant 0 : i32
    return %arg0, %c0_i32 : i32, i32
  }
}

</mosaic_0001>

<bundles_post_ra>
// kernel: tpu_custom_call.1
= control target key start
LH: loop header
LB: loop body
LE: loop exit
PB: predicated region body
PF: predicated region fallthrough
CT: control target
= control target key end

     0   :  { %6 = vsyncpa [#allocation3], 0  ;;  %s164_s0 = inlined_call_operand.hbm [shape: f32[2,1024], index: 0, kind: input, shape index: {}]   ;;  %s165_s1 = inlined_call_operand.hbm [shape: f32[2,1024], index: 1, kind: output, shape index: {}]  }
   0x1   :  { %7 = vsyncpa [#allocation4], 0  ;;  %s128_s6 = smov [#allocation2]   ;;  %s80_s10 = scalar_lea.hbm %s164_s0, 256 }
   0x2   :  { %s14_s7 = sshll.u32 %s128_s6, 4  ;;  %p81_p0 = scmp.ne.s32.totalorder %s164_s0, %s80_s10  ;;  %s15_s7 = int_to_ptr.vmem [resolvable:$true] %s14_s7 }
   0x3   :  { %p84_p1 = scmp.lt.u32.totalorder %s80_s10, %s164_s0 }
   0x5   :  { %p86_p2 = pnand %p84_p1, %p81_p0 }
   0x7   :  { %89 = shalt.err (!%p86_p2)
}
   0x8   :  { %s90_s15 = scalar_lea.vmem %s15_s7, 256  ;;  %p95_p4 = scmp.lt.s32.totalorder %s15_s7, %s15_s7 }
   0x9   :  { %p91_p3 = scmp.ne.s32.totalorder %s15_s7, %s90_s15  ;;  %p96_p5 = scmp.lt.s32.totalorder %s90_s15, %s90_s15 }
   0xb   :  { %p97_p6 = por %p96_p5, %p95_p4 }
   0xd   :  { %p98_p7 = pnand %p97_p6, %p91_p3 }
   0xf   :  { %101 = shalt.err (!%p98_p7)
}
  0x10   :  { %17 = dma.hbm_to_vmem [thread:$0]  %s164_s0, 256, %s15_s7, [#allocation3]  }
  0x11   :  { %124 = dma.done.wait [#allocation3], 256  }
  0x12   :  { %125 = vsyncadd [#allocation3], 4294967040  ;;  %v21_v0 = vld [vmem:[#allocation2] sm:$0xff]  ;;  %v22_v1 = vld [vmem:[#allocation2 + $0x8] sm:$0xff]  ;;  %s129_s0 = smov [#allocation5]  }
  0x13   :  { %v23_v2 = vadd.f32 -13.81551, %v21_v0  ;;  %v24_v3 = vadd.f32 -13.81551, %v22_v1  ;;  %s61_s18 = sshll.u32 %s129_s0, 4  ;;  %s62_s18 = int_to_ptr.vmem [resolvable:$true] %s61_s18 }
  0x14   :  { %s102_s19 = scalar_lea.vmem %s62_s18, 256  ;;  %p107_p9 = scmp.lt.s32.totalorder %s62_s18, %s62_s18 }
  0x15   :  { %v25_v4 = vmin.f32 %v23_v2, 20.0  ;;  %v26_v5 = vmin.f32 %v24_v3, 20.0  ;;  %vm27_vm1 = vcmp.gt.f32.partialorder %v23_v2, 20.0  ;;  %vm28_vm3 = vcmp.gt.f32.partialorder %v24_v3, 20.0  ;;  %p103_p8 = scmp.ne.s32.totalorder %s62_s18, %s102_s19  ;;  %p108_p10 = scmp.lt.s32.totalorder %s102_s19, %s102_s19 }
  0x17   :  { %v29_v6 = vmul.f32 1.442695, %v25_v4  ;;  %v31_v7 = vmul.f32 1.442695, %v26_v5  ;;  %p109_p11 = por %p108_p10, %p107_p9 }
  0x19   :  { %72 = vpow2.f32 %v29_v6  ;;  %p110_p12 = pnand %p109_p11, %p103_p8 }
  0x1a   :  { %74 = vpow2.f32 %v31_v7 }
  0x23   :  { %v73_v8 = vpop.eup %72 }
  0x24   :  { %v75_v9 = vpop.eup %74  ;;  %v33_v10 = vadd.f32 1.0, %v73_v8  ;;  %v36_v12 = vmul.f32 -0.5, %v73_v8  ;;  %v39_v15 = vand.u32 2147483647, %v73_v8 }
  0x25   :  { %v42_v11 = vadd.f32 1.0, %v75_v9  ;;  %v45_v13 = vmul.f32 -0.5, %v75_v9  ;;  %v48_v17 = vand.u32 2147483647, %v75_v9 }
  0x26   :  { %76 = vlog2.f32 %v33_v10  ;;  %v37_v14 = vadd.f32 1.0, %v36_v12  ;;  %vm40_vm0 = vcmp.lt.f32.partialorder %v39_v15, 0.0004427343 }
  0x27   :  { %78 = vlog2.f32 %v42_v11  ;;  %v46_v16 = vadd.f32 1.0, %v45_v13  ;;  %vm49_vm2 = vcmp.lt.f32.partialorder %v48_v17, 0.0004427343 }
  0x28   :  { %v38_v18 = vmul.f32 %v73_v8, %v37_v14 }
  0x29   :  { %v47_v20 = vmul.f32 %v75_v9, %v46_v16 }
  0x30   :  { %v77_v19 = vpop.eup %76 }
  0x31   :  { %v79_v21 = vpop.eup %78  ;;  %v35_v22 = vmul.f32 0.6931472, %v77_v19 }
  0x32   :  { %v44_v23 = vmul.f32 0.6931472, %v79_v21 }
  0x33   :  { %v41_v24 = vsel %vm40_vm0, %v38_v18, %v35_v22 }
  0x34   :  { %v51_v25 = vsel %vm27_vm1, %v23_v2, %v41_v24  ;;  %v50_v26 = vsel %vm49_vm2, %v47_v20, %v44_v23 }
  0x35   :  { %53 = vst [vmem:[#allocation5] sm:$0xff] %v51_v25  ;;  %v52_v27 = vsel %vm28_vm3, %v24_v3, %v50_v26 }
  0x36   :  { %54 = vst [vmem:[#allocation5 + $0x8] sm:$0xff] %v52_v27 }
  0x37   :  { %113 = shalt.err (!%p110_p12)
}
  0x38   :  { %s114_s22 = scalar_lea.hbm %s165_s1, 256 }
  0x39   :  { %p115_p13 = scmp.ne.s32.totalorder %s165_s1, %s114_s22  ;;  %p118_p0 = scmp.lt.u32.totalorder %s114_s22, %s165_s1 }
  0x3b   :  { %p120_p1 = pnand %p118_p0, %p115_p13 }
  0x3d   :  { %123 = shalt.err (!%p120_p1)
}
  0x3e   :  { %64 = dma.vmem_to_hbm [thread:$0]  %s62_s18, 256, %s165_s1, [#allocation4]  }
  0x3f   :  { %126 = dma.done.wait [#allocation4], 256  }
  0x40   :  { %127 = vsyncadd [#allocation4], 4294967040 }
  0x41   :  { %68 = vsyncpa [#allocation3], 1 }
  0x42   :  { %69 = vsyncpa [#allocation4], 1 }

</bundles_post_ra>
